<compile_context>
chip_gen: v6e
topology: v6e:2x2x1
jax: 0.10.0
libtpu: 0.0.40
codegen_flags: <defaults>
</compile_context>

<pallas_src>
from typing import NamedTuple

import jax
import jax.numpy as jnp
from jax.experimental import pallas as pl
from jax.experimental.pallas import tpu as pltpu


def _round_up(x, m):
    return (x + m - 1) // m * m


def _pad2(a, rows, cols):
    pr, pc = rows - a.shape[0], cols - a.shape[1]
    if pr or pc:
        a = jnp.pad(a, ((0, pr), (0, pc)))
    return a


def _vmem_cap_bytes():
    """Per-chip scoped-VMEM cap, leaving headroom for compiler scratch.

    64 MiB/TC (v7x) -> ~48 MiB; 128 MiB (v5e/v6e) -> ~96 MiB.
    """
    try:
        cap = int(pltpu.get_tpu_info().vmem_capacity_bytes)
    except Exception:
        cap = 64 << 20
    return max(cap * 3 // 4, 16 << 20)


class _TilePlan(NamedTuple):
    tm: int
    tn: int
    tk: int
    d_in: int
    d_out: int


class TextNNParams(NamedTuple):
    plan: _TilePlan
    w_padded: jax.Array   # (Kp, Np), compute dtype (bf16), zero-padded
    b_padded: jax.Array   # (1, Np), float32, zero-padded


def _make_plan(batch, d_in, d_out, tile_m, tile_n, tile_k):
    # bf16 packs 16 rows per sublane group -> keep tm a multiple of 16;
    # tn/tk stay multiples of 128 (lane width / MXU-friendly).
    tm = min(_round_up(tile_m, 16), _round_up(batch, 16))
    tn = min(_round_up(tile_n, 128), _round_up(d_out, 128))
    tk = min(_round_up(tile_k, 128), _round_up(d_in, 128))
    # If the parallel (M, N) grid would collapse to a single block, halve tn
    # (>= 128) so v7x's two TensorCores both get work.  On single-TC v5e/v6e
    # this only costs one extra ~0.35us grid step.
    grid_m = _round_up(batch, tm) // tm
    grid_n = _round_up(d_out, tn) // tn
    if grid_m == 1 and grid_n == 1 and tn > 128:
        tn = max(128, _round_up(tn // 2, 128))
    return _TilePlan(tm=tm, tn=tn, tk=tk, d_in=d_in, d_out=d_out)


def prepare_text_nn_params(
    w,
    b,
    *,
    batch_hint=128,
    tile_m=256,
    tile_n=512,
    tile_k=1024,
    compute_dtype=jnp.bfloat16,
):
    """Cast + pad the weights ONCE, outside the per-step hot path.

    w: (D_in, D_out) float32 (transposed PyTorch Linear weight)
    b: (D_out,)      float32
    """
    d_in, d_out = w.shape
    plan = _make_plan(batch_hint, d_in, d_out, tile_m, tile_n, tile_k)
    kp = _round_up(d_in, plan.tk)
    np_ = _round_up(d_out, plan.tn)
    wc = _pad2(w.astype(compute_dtype), kp, np_)
    bc = _pad2(b.reshape(1, d_out).astype(jnp.float32), 1, np_)
    return TextNNParams(plan=plan, w_padded=wc, b_padded=bc)


def _dense_relu_kernel(x_ref, w_ref, b_ref, o_ref):
    # x_ref: (tm, tk) bf16   w_ref: (tk, tn) bf16   b_ref: (1, tn) f32
    # o_ref: (tm, tn) f32 -- K-resident output block doubles as the accumulator.
    k = pl.program_id(2)

    @pl.when(k == 0)
    def _():
        # Seed the accumulator with the broadcast bias (no epilogue add).
        o_ref[...] = jnp.broadcast_to(b_ref[...], o_ref.shape)

    o_ref[...] += jnp.dot(
        x_ref[...], w_ref[...], preferred_element_type=jnp.float32
    )

    @pl.when(k == pl.num_programs(2) - 1)
    def _():
        o_ref[...] = jnp.maximum(o_ref[...], 0.0)


def text_nn_forward_prepared(x, params: TextNNParams):
    """relu(x @ W + b) with pre-cast / pre-padded weights (hot path)."""
    plan = params.plan
    B, d_in = x.shape
    assert d_in == plan.d_in, "weight/input dim mismatch"
    tm, tn, tk = plan.tm, plan.tn, plan.tk
    kp, np_ = params.w_padded.shape
    mp = _round_up(B, tm)

    compute_dtype = params.w_padded.dtype
    csize = jnp.dtype(compute_dtype).itemsize

    # Only the (small, per-call) activation needs cast + zero-pad here.
    xc = _pad2(x.astype(compute_dtype), mp, kp)

    grid = (mp // tm, np_ // tn, kp // tk)

    tile_bytes = (
        2 * (tm * tk + tk * tn) * csize   # double-buffered bf16 x / w tiles
        + 2 * tn * 4                      # double-buffered bias slab (f32)
        + 2 * tm * tn * 4                 # double-buffered f32 out/acc tile
    )
    vmem_limit = int(min(max(4 * tile_bytes, 32 << 20), _vmem_cap_bytes()))

    cost = pl.CostEstimate(
        flops=2 * B * plan.d_in * plan.d_out,
        transcendentals=0,
        bytes_accessed=(
            B * plan.d_in * csize
            + plan.d_in * plan.d_out * csize
            + plan.d_out * 4
            + B * plan.d_out * 4
        ),
    )

    out = pl.pallas_call(
        _dense_relu_kernel,
        out_shape=jax.ShapeDtypeStruct((mp, np_), jnp.float32),
        grid_spec=pltpu.PrefetchScalarGridSpec(
            num_scalar_prefetch=0,
            grid=grid,
            in_specs=[
                pl.BlockSpec((tm, tk), lambda i, j, k: (i, k)),  # x tile
                pl.BlockSpec((tk, tn), lambda i, j, k: (k, j)),  # w tile
                pl.BlockSpec((1, tn), lambda i, j, k: (0, j)),   # bias slab
            ],
            out_specs=pl.BlockSpec((tm, tn), lambda i, j, k: (i, j)),
        ),
        compiler_params=pltpu.CompilerParams(
            dimension_semantics=("parallel", "parallel", "arbitrary"),
            vmem_limit_bytes=vmem_limit,
        ),
        cost_estimate=cost,
    )(xc, params.w_padded, params.b_padded)

    return out[:B, :plan.d_out]


def text_nn_forward(x, w, b, **kwargs):
    """Convenience path (casts + pads W/b per call).

    For hot loops, call prepare_text_nn_params once and reuse
    text_nn_forward_prepared -- that removes the per-call weight cast+pad,
    which otherwise dominates HBM traffic for this memory-bound GEMM.
    """
    params = prepare_text_nn_params(w, b, batch_hint=x.shape[0], **kwargs)
    return text_nn_forward_prepared(x, params)


def init_text_nn_params(key, input_dim, output_dim):
    """Deterministic init matching nn.Linear default: U(-1/sqrt(in), 1/sqrt(in))."""
    kw, kb = jax.random.split(key)
    bound = 1.0 / (input_dim ** 0.5)
    # PyTorch stores weight as (out, in); we store its transpose (in, out).
    w = jax.random.uniform(kw, (input_dim, output_dim), jnp.float32, -bound, bound)
    b = jax.random.uniform(kb, (output_dim,), jnp.float32, -bound, bound)
    return w, b


if __name__ == "__main__":
    key = jax.random.PRNGKey(0)
    kx, kp = jax.random.split(key)

    # Small shapes consistent with the module (a feature-vector MLP).
    batch, input_dim, output_dim = 24, 384, 256

    x = jax.random.normal(kx, (batch, input_dim), jnp.float32)
    w, b = init_text_nn_params(kp, input_dim, output_dim)

    # 1) Hot path: weights cast + padded once, reused across forwards.
    #    (default tiles; plan splits N into two 128-wide blocks for 2-TC chips)
    params = prepare_text_nn_params(w, b, batch_hint=batch)
    out = jax.block_until_ready(text_nn_forward_prepared(x, params))

    # 2) Small explicit tiles: exercises M/N tiling, K accumulation (bias-seeded
    #    accumulator), and the batch-padding path (24 rows -> padded to 32).
    out_tiled = jax.block_until_ready(
        text_nn_forward(x, w, b, tile_m=16, tile_n=128, tile_k=128)
    )

    # Reference with the same bf16-operand / f32-accumulate math as the kernel.
    xc = x.astype(jnp.bfloat16)
    wc = w.astype(jnp.bfloat16)
    ref = jnp.maximum(
        jnp.dot(xc, wc, preferred_element_type=jnp.float32) + b[None, :], 0.0
    )
    # Full-precision reference (loose tolerance: bf16 operand rounding).
    ref_f32 = jnp.maximum(x @ w + b[None, :], 0.0)

    assert out.shape == (batch, output_dim)
    assert out_tiled.shape == (batch, output_dim)
    assert jnp.allclose(out, ref, atol=1e-5, rtol=1e-5)
    assert jnp.allclose(out_tiled, ref, atol=1e-3, rtol=1e-3)
    assert jnp.allclose(out, ref_f32, atol=1e-1, rtol=1e-1)
    assert jnp.allclose(out, out_tiled, atol=1e-3, rtol=1e-3)

    print("KERNEL_OK")
</pallas_src>

<mosaic_0001>
module attributes {stable_mosaic.version = 11 : i64} {
  func.func @_dense_relu_kernel(%arg0: i32, %arg1: i32, %arg2: i32, %arg3: memref<32x384xbf16, #tpu.memory_space<vmem>>, %arg4: memref<384x128xbf16, #tpu.memory_space<vmem>>, %arg5: memref<1x128xf32, #tpu.memory_space<vmem>>, %arg6: memref<32x128xf32, #tpu.memory_space<vmem>>) attributes {dimension_semantics = [#tpu.dimension_semantics<parallel>, #tpu.dimension_semantics<parallel>, #tpu.dimension_semantics<arbitrary>], iteration_bounds = array<i64: 1, 2, 1>, scalar_prefetch = 0 : i64, scratch_operands = 0 : i64, tpu.core_type = #tpu.core_type<tc>, window_params = [{transform_indices = @transform_0, window_bounds = array<i64: 32, 384>}, {transform_indices = @transform_1, window_bounds = array<i64: 384, 128>}, {transform_indices = @transform_2, window_bounds = array<i64: 1, 128>}, {transform_indices = @transform_3, window_bounds = array<i64: 32, 128>}]} {
    %c0_i32 = arith.constant 0 : i32
    %0 = arith.cmpi eq, %arg2, %c0_i32 : i32
    %1 = arith.extui %0 : i1 to i32
    %c0_i32_0 = arith.constant 0 : i32
    %2 = arith.cmpi ne, %1, %c0_i32_0 : i32
    scf.if %2 {
      %c0_10 = arith.constant 0 : index
      %c0_11 = arith.constant 0 : index
      %12 = vector.load %arg5[%c0_10, %c0_11] : memref<1x128xf32, #tpu.memory_space<vmem>>, vector<1x128xf32>
      %13 = vector.shape_cast %12 : vector<1x128xf32> to vector<1x128xf32>
      %14 = vector.broadcast %13 : vector<1x128xf32> to vector<32x128xf32>
      %c0_12 = arith.constant 0 : index
      %c0_13 = arith.constant 0 : index
      %15 = vector.load %arg6[%c0_12, %c0_13] : memref<32x128xf32, #tpu.memory_space<vmem>>, vector<32x128xf32>
      tpu.vector_store %arg6[%c0_12, %c0_13], %14 {strides = array<i32>} : memref<32x128xf32, #tpu.memory_space<vmem>>, vector<32x128xf32>,
    } else {
    }
    %c0 = arith.constant 0 : index
    %c0_1 = arith.constant 0 : index
    %3 = vector.load %arg6[%c0, %c0_1] : memref<32x128xf32, #tpu.memory_space<vmem>>, vector<32x128xf32>
    %c0_2 = arith.constant 0 : index
    %c0_3 = arith.constant 0 : index
    %4 = vector.load %arg3[%c0_2, %c0_3] : memref<32x384xbf16, #tpu.memory_space<vmem>>, vector<32x384xbf16>
    %c0_4 = arith.constant 0 : index
    %c0_5 = arith.constant 0 : index
    %5 = vector.load %arg4[%c0_4, %c0_5] : memref<384x128xbf16, #tpu.memory_space<vmem>>, vector<384x128xbf16>
    %cst = arith.constant dense<0.000000e+00> : vector<32x128xf32>
    %6 = tpu.matmul %4, %5, %cst {dimension_numbers = #tpu.dot_dimension_numbers<[1], [0], [0], [1], [0, 0, 1, 1], [], []>} : vector<32x384xbf16>, vector<384x128xbf16>, vector<32x128xf32> -> vector<32x128xf32>
    %7 = arith.addf %3, %6 : vector<32x128xf32>
    %c0_6 = arith.constant 0 : index
    %c0_7 = arith.constant 0 : index
    %8 = vector.load %arg6[%c0_6, %c0_7] : memref<32x128xf32, #tpu.memory_space<vmem>>, vector<32x128xf32>
    tpu.vector_store %arg6[%c0_6, %c0_7], %7 {strides = array<i32>} : memref<32x128xf32, #tpu.memory_space<vmem>>, vector<32x128xf32>,
    %c0_i32_8 = arith.constant 0 : i32
    %9 = arith.cmpi eq, %arg2, %c0_i32_8 : i32
    %10 = arith.extui %9 : i1 to i32
    %c0_i32_9 = arith.constant 0 : i32
    %11 = arith.cmpi ne, %10, %c0_i32_9 : i32
    scf.if %11 {
      %c0_10 = arith.constant 0 : index
      %c0_11 = arith.constant 0 : index
      %12 = vector.load %arg6[%c0_10, %c0_11] : memref<32x128xf32, #tpu.memory_space<vmem>>, vector<32x128xf32>
      %cst_12 = arith.constant 0.000000e+00 : f32
      %13 = vector.broadcast %cst_12 : f32 to vector<32x128xf32>
      %14 = arith.maximumf %12, %13 : vector<32x128xf32>
      %c0_13 = arith.constant 0 : index
      %c0_14 = arith.constant 0 : index
      %15 = vector.load %arg6[%c0_13, %c0_14] : memref<32x128xf32, #tpu.memory_space<vmem>>, vector<32x128xf32>
      tpu.vector_store %arg6[%c0_13, %c0_14], %14 {strides = array<i32>} : memref<32x128xf32, #tpu.memory_space<vmem>>, vector<32x128xf32>,
    } else {
    }
    return
  }
  func.func @transform_0(%arg0: i32, %arg1: i32, %arg2: i32) -> (i32, i32) {
    %c0_i32 = arith.constant 0 : i32
    return %arg0, %arg2 : i32, i32
  }
  func.func @transform_1(%arg0: i32, %arg1: i32, %arg2: i32) -> (i32, i32) {
    %c0_i32 = arith.constant 0 : i32
    return %arg2, %arg1 : i32, i32
  }
  func.func @transform_2(%arg0: i32, %arg1: i32, %arg2: i32) -> (i32, i32) {
    %c0_i32 = arith.constant 0 : i32
    %c0_i32_0 = arith.constant 0 : i32
    return %c0_i32, %arg1 : i32, i32
  }
  func.func @transform_3(%arg0: i32, %arg1: i32, %arg2: i32) -> (i32, i32) {
    %c0_i32 = arith.constant 0 : i32
    return %arg0, %arg1 : i32, i32
  }
}

</mosaic_0001>

<bundles_post_ra>
// kernel: tpu_custom_call.1
= control target key start
LH: loop header
LB: loop body
LE: loop exit
PB: predicated region body
PF: predicated region fallthrough
CT: control target
= control target key end

     0   :  { %8 = vsyncpa [#allocation3], 0  ;;  %s1358_s0 = inlined_call_operand.hbm [shape: bf16[32,384], index: 0, kind: input, shape index: {}]   ;;  %s1359_s1 = inlined_call_operand.hbm [shape: bf16[384,256], index: 1, kind: input, shape index: {}]   ;;  %s1360_s2 = inlined_call_operand.vmem [shape: f32[1,256], index: 2, kind: input, shape index: {}]   ;;  %s1361_s3 = inlined_call_operand.hbm [shape: f32[32,256], index: 3, kind: output, shape index: {}]  }
   0x1   :  { %9 = vsyncpa [#allocation6], 0 }
   0x2   :  { %11 = vsyncpa [#allocation6 + $0x1], 0 }
   0x3   :  { %12 = vsyncpa [#allocation4], 0 }
   0x4   :  { %14 = vsyncpa [#allocation4 + $0x1], 0  ;;  %s1151_s12 = smov 0   ;;  %s1153_s13 = smov 0  }
   0x5   :  { %s1155_s14 = smov 0   ;;  %s1157_s15 = smov 0  }
   0x6   :  { %s1159_s16 = smov 0   ;;  %s1161_s17 = smov 0  }
   0x7 LB: > { %1367 = sst [smem:[#allocation11_spill]] %s1118_s17  ;;  %s763_s18 = sadd.s32 4294967295, %s1118_s17   ;;  %s1118_s17 = sphi %s1161_s17, %s20_s17   ;;  %s1114_s16 = sphi %s1159_s16, %s1387_s16   ;;  %s1110_s15 = sphi %s1157_s15, %s1386_s15   ;;  %s1106_s14 = sphi %s1155_s14, %s1385_s14   ;;  %s1102_s13 = sphi %s1153_s13, %s1384_s13   ;;  %s1098_s12 = sphi %s1151_s12, %s1383_s12  }
   0x8   : > { %s764_s19 = sadd.s32 4294967294, %s1118_s17   ;;  %p83_p0 = scmp.ne.s32.totalorder %s1106_s14, %s1102_s13 }
   0x9   : > { %p84_p1 = scmp.eq.s32.totalorder %s1118_s17, 0  ;;  %p89_p2 = scmp.ne.s32.totalorder %s1102_s13, %s1098_s12 }
   0xa   : > { %p1188_p3 = scmp.eq.s32.totalorder %s763_s18, 0  ;;  %p141_p5 = scmp.eq.s32.totalorder %s763_s18, 1 }
   0xb   : > { %p1192_p4 = por %p84_p1, %p83_p0  ;;  %p147_p7 = scmp.eq.s32.totalorder %s764_s19, 1 }
   0xc   : > { %p1198_p6 = por %p1188_p3, %p89_p2  ;;  %p1202_p8 = por %p141_p5, %p83_p0 }
   0xd   : > { %p765_p9 = scmp.ge.s32.totalorder %s1118_s17, 1  ;;  %p1207_p10 = por %p147_p7, %p89_p2 }
   0xe   : > { %s1370_s22 = scalar_select %p1198_p6, 1, 0 }
   0xf   : > { %s1371_s23 = scalar_select %p1202_p8, 1, 0 }
  0x10   : > { %s1372_s24 = scalar_select %p1207_p10, 1, 0 }
  0x11   : > { %p154_p11 = scmp.lt.s32.totalorder %s1118_s17, 3  ;;  %s1120_s26 = smov [#allocation2]  }
  0x12   : > { %1373 = sst [smem:[#allocation12_spill]] %s1372_s24  ;;  %s172_s27 = sshll.u32 %s1120_s26, 4  ;;  %s173_s27 = int_to_ptr.vmem [resolvable:$true] %s172_s27 }
  0x13   : > { %p1212_p12 = pnand %p765_p9, %p154_p11  ;;  %p888_p1 = scmp.lt.s32.totalorder %s1118_s17, 2 }
  0x14   : > { %s35_s30 = sadd.s32 1, %s1114_s16  ;;  %s991_s4 = scalar_lea.vmem %s173_s27, 768 }
  0x15   : > { %p875_p13 = pneg %p1212_p12  ;;  %p1228_p2 = pnand %p888_p1, %p1192_p4 }
  0x16   : > { %p992_p9 = scmp.ne.s32.totalorder %s173_s27, %s991_s4  ;;  %p999_p0 = scmp.lt.s32.totalorder %s173_s27, %s173_s27 }
  0x17   : > { %p1222_p5 = pnand %p875_p13, %p1188_p3  ;;  %p1000_p8 = scmp.lt.s32.totalorder %s991_s4, %s991_s4 }
  0x19   : > { %p982_p7 = pneg %p1222_p5  ;;  %p1001_p6 = por %p1000_p8, %p999_p0 }
  0x1b   : > { %p994_p11 = pnand %p992_p9, %p982_p7 }
  0x1d   : > { %p995_p10 = pneg %p994_p11 }
  0x1f   : > { %p1002_p13 = pnand %p1001_p6, %p995_p10 }
  0x21   : > { %1005 = shalt.err (!%p1002_p13)
}
  0x22   : > { %s1121_s5 = smov 192   ;;  %s1122_s6 = smov 12  }
  0x23   : > { %878 = dma.hbm_to_vmem [thread:$0]  (!%p1222_p5), %s1358_s0, 768, %s173_s27, [#allocation3], %s1121_s5, %s1121_s5, %s1122_s6  }
  0x24   : > { %p37_p4 = scmp.ge.s32.totalorder %s35_s30, 2  ;;  %s76_s9 = sadd.s32 1, %s1106_s14 }
  0x25   : > { %s186_s10 = sand.u32 1, %s1106_s14   ;;  %s768_s19 = sshll.u32 %s1114_s16, 6 }
  0x26   : > { %s1389_s30 = smov (%p37_p4, %s35_s30), 0  ;;  %s865_s11 = smul.u32 192, %s186_s10 }
  0x27   : > { %s72_s18 = ssub.s32 %s1114_s16, %s1389_s30  ;;  %s198_s4 = scalar_lea.hbm %s1359_s1, %s768_s19 }
  0x28   : > { %p74_p6 = scmp.eq.s32.totalorder %s72_s18, 0  ;;  %s190_s28 = scalar_lea.vmem [#allocation5], %s865_s11 }
  0x29   : > { %s199_s17 = sshll.u32 %s190_s28, 4  ;;  %s187_s27 = scalar_lea.sflag [#allocation6], %s186_s10  ;;  %s200_s17 = int_to_ptr.vmem [resolvable:$true] %s199_s17 }
  0x2a   : > { %s1251_s24 = scalar_select %p74_p6, %s1106_s14, %s76_s9  }
  0x2b   : > { %p1008_p8 = pneg %p1228_p2  ;;  %s1019_s5 = scalar_lea.vmem %s200_s17, 3072 }
  0x2c   : > { %p1020_p10 = scmp.ne.s32.totalorder %s200_s17, %s1019_s5  ;;  %s1123_s6 = smov [#allocation5]  }
  0x2d   : > { %s1024_s7 = sshll.u32 %s1123_s6, 4  ;;  %s1025_s7 = int_to_ptr.vmem [resolvable:$false] %s1024_s7 }
  0x2e   : > { %p1022_p0 = pnand %p1020_p10, %p1008_p8  ;;  %s1026_s8 = scalar_lea.vmem %s1025_s7, 6144 }
  0x2f   : > { %p1027_p5 = scmp.lt.s32.totalorder %s200_s17, %s1025_s7  ;;  %p1028_p7 = scmp.lt.s32.totalorder %s1026_s8, %s1019_s5 }
  0x30   : > { %p1023_p1 = pneg %p1022_p0 }
  0x31   : > { %p1029_p9 = por %p1028_p7, %p1027_p5 }
  0x33   : > { %p1030_p11 = pnand %p1029_p9, %p1023_p1 }
  0x35   : > { %1033 = shalt.err (!%p1030_p11)
}
  0x36   : > { %s1124_s11 = smov 128   ;;  %s1125_s9 = smov 64  }
  0x37   : > { %s1126_s18 = smov 4   ;;  %217 = sbr.rel (%p1212_p12) target bundleno = 329 (0x149), region = 32 }
  0x38   : > { %882 = dma.hbm_to_vmem [thread:$0]  (!%p1228_p2), %s198_s4, 3072, %s200_s17, %s187_s27, %s1124_s11, %s1125_s9, %s1126_s18  }
  0x3c   : > { %1085 = dma.done.wait (%p1188_p3), [#allocation3], 768  }
  0x3d   : > { %1087 = vsyncadd (%p1188_p3), [#allocation3], 4294966528  ;;  %s1264_s10 = sand.u32 1, %s1102_s13   ;;  %p1377_p2 = scmp.ne.s32.totalorder %s1370_s22, 0 }
  0x3e   : > { %s866_s19 = smul.u32 192, %s1264_s10  ;;  %s224_s21 = scalar_lea.sflag [#allocation6], %s1264_s10 }
  0x40   : > { %s1268_s26 = scalar_lea.vmem [#allocation5], %s866_s19 }
  0x41   : > { %1089 = dma.done.wait (%p1377_p2), %s224_s21, 3072  }
  0x42   : > { %1091 = vsyncadd (%p1377_p2), %s224_s21, 4294964224  ;;  %v948_v0 = vld [vmem:[%s1268_s26 + $0x78] sm:$0xff]   ;;  %v951_v3 = vld [vmem:[%s1268_s26 + $0x70] sm:$0xff]   ;;  %p256_p3 = scmp.lt.s32.totalorder %s1110_s15, 1  ;;  %s771_s29 = sshll.u32 %s1264_s10, 5 }
  0x43   : > { %v949_v1 = vld [vmem:[%s1268_s26 + $0x38] sm:$0xff]   ;;  %807 = vmatprep.subr.bf16.mxu0 %v948_v0  ;;  %v952_v4 = vld [vmem:[%s1268_s26 + $0x30] sm:$0xff]   ;;  %v954_v6 = vld [vmem:[%s1268_s26 + $0x68] sm:$0xff]   ;;  %s252_s4 = scalar_lea.vmem [#allocation7], %s771_s29  ;;  %s804_s28 = sshll.u32 %s1110_s15, 7 }
  0x44   : > { %v950_v2 = vld [vmem:[%s1268_s26 + $0xb8] sm:$0xff]   ;;  %808 = vmatpush3.bf16.msra.mxu0 %v949_v1  ;;  %v953_v5 = vld [vmem:[%s1268_s26 + $0xb0] sm:$0xff]   ;;  %v955_v7 = vld [vmem:[%s1268_s26 + $0x28] sm:$0xff]   ;;  %s257_s17 = scalar_select %p256_p3, %s1110_s15, 1 }
  0x45   : > { %845 = vmatprep.subr.bf16.mxu1 %v950_v2  ;;  %809 = vmatprep.subr.bf16.mxu0 %v951_v3  ;;  %v956_v8 = vld [vmem:[%s1268_s26 + $0xa8] sm:$0xff]   ;;  %v957_v9 = vld [vmem:[%s1268_s26 + $0x60] sm:$0xff]   ;;  %v960_v12 = vld [vmem:[%s1268_s26 + $0x58] sm:$0xff]   ;;  %s649_s27 = sshll.u32 %s252_s4, 4  ;;  %s1308_s7 = scalar_lea.hbm %s1361_s3, %s804_s28  ;;  %s1310_s27 = int_to_ptr.vmem [resolvable:$true] %s649_s27 }
  0x46   : > { %846 = vmatpush3.bf16.msra.mxu1 %v950_v2  ;;  %v958_v10 = vld [vmem:[%s1268_s26 + $0x20] sm:$0xff]   ;;  %v962_v13 = vld [vmem:[%s1268_s26 + $0x98] sm:$0xff]   ;;  %v963_v15 = vld [vmem:[%s1268_s26 + $0x50] sm:$0xff]   ;;  %s258_s25 = scalar_lea.vmem %s1360_s2, %s257_s17  ;;  %s634_s8 = scalar_lea.sflag [#allocation4], %s1264_s10 }
  0x47   : > { %847 = vmatprep.subr.bf16.mxu1 %v953_v5  ;;  %v959_v11 = vld [vmem:[%s1268_s26 + $0xa0] sm:$0xff]   ;;  %v961_v14 = vld [vmem:[%s1268_s26 + $0x18] sm:$0xff]   ;;  %v965_v16 = vld [vmem:[%s1268_s26 + $0x90] sm:$0xff]   ;;  %s1034_s11 = scalar_lea.vmem %s1310_s27, 512  ;;  %p1378_p13 = scmp.ne.s32.totalorder %s1371_s23, 0 }
  0x48   : > { %810 = vmatpush3.bf16.msra.mxu0 %v952_v4  ;;  %v964_v17 = vld [vmem:[%s1268_s26 + $0x10] sm:$0xff]   ;;  %v966_v18 = vld [vmem:[%s1268_s26 + $0x48] sm:$0xff]   ;;  %v969_v21 = vld [vmem:[%s1268_s26 + $0x40] sm:$0xff]   ;;  %p1035_p12 = scmp.ne.s32.totalorder %s1310_s27, %s1034_s11  ;;  %s1127_s15 = smov [#allocation7]  }
  0x49   : > { %811 = vmatprep.subr.bf16.mxu0 %v954_v6  ;;  %v967_v19 = vld [vmem:[%s1268_s26 + $0x8] sm:$0xff]   ;;  %v971_v22 = vld [vmem:[%s1268_s26 + $0x80] sm:$0xff]   ;;  %v972_v26 = vld [vmem:[#allocation2] ss:$12 sps:$4 sm:$0xff]   ;;  %s1038_s9 = sshll.u32 %s1127_s15, 4  ;;  %s1039_s9 = int_to_ptr.vmem [resolvable:$false] %s1038_s9 }
  0x4a   : > { %848 = vmatpush3.bf16.msra.mxu1 %v953_v5  ;;  %v968_v20 = vld [vmem:[%s1268_s26 + $0x88] sm:$0xff]   ;;  %v974_v23 = vld [vmem:[#allocation2 + $0x4] ss:$12 sps:$4 sm:$0xff]   ;;  %v975_v24 = vld [vmem:[#allocation2 + $0x8] ss:$12 sps:$4 sm:$0xff]   ;;  %p1036_p4 = pnand %p1035_p12, %p1378_p13  ;;  %s1040_s18 = scalar_lea.vmem %s1039_s9, 1024 }
  0x4b   : > { %849 = vmatprep.subr.bf16.mxu1 %v956_v8  ;;  %v970_v25 = vld [vmem:[%s1268_s26] sm:$0xff]   ;;  %544 = vmatprep.mubr.bf16.mxu0 %v974_v23  ;;  %v977_v27 = vld [vmem:[#allocation2 + $0x1c] ss:$12 sps:$4 sm:$0xff]   ;;  %v976_v28 = vld [vmem:[#allocation2 + $0x20] ss:$12 sps:$4 sm:$0xff]   ;;  %p1041_p8 = scmp.lt.s32.totalorder %s1310_s27, %s1039_s9  ;;  %p1042_p10 = scmp.lt.s32.totalorder %s1040_s18, %s1034_s11 }
  0x4c   : > { %812 = vmatpush3.bf16.msra.mxu0 %v955_v7  ;;  %861 = vmatprep.mubr.bf16.mxu1 %v975_v24  ;;  %v979_v29 = vld [vmem:[#allocation2 + $0x18] ss:$12 sps:$4 sm:$0xff]   ;;  %v772_v35 = vld [vmem:[%s258_s25] ss:$0 sm:$0xff]  ;;  %p1037_p6 = pneg %p1036_p4 }
  0x4d   : > { %813 = vmatprep.subr.bf16.mxu0 %v957_v9  ;;  %p1043_p0 = por %p1042_p10, %p1041_p8 }
  0x4e   : > { %850 = vmatpush3.bf16.msra.mxu1 %v956_v8 }
  0x4f   : > { %851 = vmatprep.subr.bf16.mxu1 %v959_v11  ;;  %p1044_p1 = pnand %p1043_p0, %p1037_p6 }
  0x50   : > { %814 = vmatpush3.bf16.msra.mxu0 %v958_v10 }
  0x51   : > { %815 = vmatprep.subr.bf16.mxu0 %v960_v12 }
  0x52   : > { %852 = vmatpush3.bf16.msra.mxu1 %v959_v11 }
  0x53   : > { %853 = vmatprep.subr.bf16.mxu1 %v962_v13 }
  0x54   : > { %816 = vmatpush3.bf16.msra.mxu0 %v961_v14 }
  0x55   : > { %817 = vmatprep.subr.bf16.mxu0 %v963_v15 }
  0x56   : > { %854 = vmatpush3.bf16.msra.mxu1 %v962_v13 }
  0x57   : > { %855 = vmatprep.subr.bf16.mxu1 %v965_v16 }
  0x58   : > { %818 = vmatpush3.bf16.msra.mxu0 %v964_v17 }
  0x59   : > { %819 = vmatprep.subr.bf16.mxu0 %v966_v18 }
  0x5a   : > { %856 = vmatpush3.bf16.msra.mxu1 %v965_v16 }
  0x5b   : > { %857 = vmatprep.subr.bf16.mxu1 %v968_v20 }
  0x5c   : > { %820 = vmatpush3.bf16.msra.mxu0 %v967_v19 }
  0x5d   : > { %821 = vmatprep.subr.bf16.mxu0 %v969_v21 }
  0x5e   : > { %858 = vmatpush3.bf16.msra.mxu1 %v968_v20 }
  0x5f   : > { %859 = vmatprep.subr.bf16.mxu1 %v971_v22 }
  0x60   : > { %822 = vmatpush3.bf16.msra.mxu0 %v970_v25 }
  0x62   : > { %860 = vmatpush3.bf16.msra.mxu1 %v971_v22 }
  0x63   : > { %545 = vmatmul.mubr.bf16.vlgmr.msra.gmra.mxu0 %v972_v26 }
  0x64   : > { %552 = vmatprep.mubr.bf16.mxu0 %v977_v27 }
  0x65   : > { %862 = vmatmul.mubr.bf16.vlgmr.msra.gmra.mxu1 %v976_v28 }
  0x6b   : > { %553 = vmatmul.mubr.bf16.gmra.mxu0 %v979_v29 }
 0x123   : > { %v823_v30 = vpop.f32.mrf.mxu0 }
 0x125   : > { %v824_v31 = vpop.f32.mrf.mxu0  ;;  %v863_v32 = vpop.f32.mrf.mxu1 }
 0x126   : > { %v825_v33 = vadd.f32 %v824_v31, %v823_v30 }
 0x127   : > { %v826_v34 = vpop.f32.mrf.mxu0  ;;  %v595_v36 = vpop.f32.mrf.mxu1 }
 0x128   : > { %v596_v37 = vadd.f32 %v825_v33, %v595_v36 }
 0x129   : > { %v827_v38 = vpop.f32.mrf.mxu0  ;;  %v864_v39 = vpop.f32.mrf.mxu1 }
 0x12a   : > { %v610_v40 = vadd.f32 %v772_v35, %v596_v37  ;;  %v828_v41 = vadd.f32 %v827_v38, %v826_v34 }
 0x12b   : > { %v829_v42 = vpop.f32.mrf.mxu0  ;;  %v598_v43 = vpop.f32.mrf.mxu1 }
 0x12c   : > { %v625_v44 = vmax.f32 %v610_v40, 0.0  ;;  %v599_v45 = vadd.f32 %v828_v41, %v598_v43 }
 0x12d   : > { %v830_v46 = vpop.f32.mrf.mxu0 }
 0x12e   : > { %629 = vst [vmem:[%s252_s4] sm:$0xff] %v625_v44  ;;  %v611_v47 = vadd.f32 %v772_v35, %v599_v45  ;;  %v831_v48 = vadd.f32 %v830_v46, %v829_v42 }
 0x12f   : > { %v832_v49 = vpop.f32.mrf.mxu0 }
 0x130   : > { %v626_v50 = vmax.f32 %v611_v47, 0.0  ;;  %v604_v51 = vadd.f32 %v863_v32, %v831_v48 }
 0x131   : > { %v833_v52 = vpop.f32.mrf.mxu0 }
 0x132   : > { %630 = vst [vmem:[%s252_s4 + $0x8] sm:$0xff] %v626_v50  ;;  %v612_v53 = vadd.f32 %v772_v35, %v604_v51  ;;  %v834_v54 = vadd.f32 %v833_v52, %v832_v49 }
 0x134   : > { %v627_v55 = vmax.f32 %v612_v53, 0.0  ;;  %v607_v56 = vadd.f32 %v864_v39, %v834_v54 }
 0x136   : > { %631 = vst [vmem:[%s252_s4 + $0x10] sm:$0xff] %v627_v55  ;;  %v613_v57 = vadd.f32 %v772_v35, %v607_v56 }
 0x138   : > { %v628_v58 = vmax.f32 %v613_v57, 0.0 }
 0x13a   : > { %632 = vst [vmem:[%s252_s4 + $0x18] sm:$0xff] %v628_v58 }
 0x13b   : > { %1047 = shalt.err (!%p1044_p1)
}
 0x13c   : > { %s1048_s19 = scalar_lea.hbm %s1308_s7, 512  ;;  %s1052_s17 = scalar_lea.hbm %s1361_s3, 1024 }
 0x13d   : > { %p1049_p5 = scmp.ne.s32.totalorder %s1308_s7, %s1048_s19  ;;  %p1053_p11 = scmp.lt.s32.totalorder %s1308_s7, %s1361_s3 }
 0x13e   : > { %p1054_p2 = scmp.lt.s32.totalorder %s1052_s17, %s1048_s19 }
 0x13f   : > { %p1050_p7 = pnand %p1049_p5, %p1378_p13 }
 0x140   : > { %p1055_p3 = por %p1054_p2, %p1053_p11 }
 0x141   : > { %p1051_p9 = pneg %p1050_p7 }
 0x143   : > { %p1056_p12 = pnand %p1055_p3, %p1051_p9 }
 0x145   : > { %1059 = shalt.err (!%p1056_p12)
}
 0x146   : > { %s1128_s25 = smov 128   ;;  %s1129_s29 = smov 256  }
 0x147   : > { %s1130_s4 = smov 8  }
 0x148   : > { %873 = dma.vmem_to_hbm [thread:$0]  (%p1378_p13), %s1310_s27, 512, %s1308_s7, %s634_s8, %s1128_s25, %s1129_s29, %s1130_s4  }
 0x149 PF: > { %s1379_s28 = sld [smem:[#allocation12_spill]]  ;;  %s664_s6 = sand.u32 1, %s1098_s12  }
 0x14a   : > { %s1380_s5 = sld [smem:[#allocation11_spill]]  ;;  %s665_s11 = scalar_lea.sflag [#allocation4], %s664_s6 }
 0x14f   : > { %p1381_p4 = scmp.ne.s32.totalorder %s1379_s28, 0 }
 0x150   : > { %p1382_p6 = scmp.ge.s32.totalorder %s1380_s5, 2 }
 0x152   : > { %p884_p8 = pnand %p1382_p6, %p1381_p4 }
 0x154   : > { %p885_p10 = pneg %p884_p8 }
 0x156   : > { %1093 = dma.done.wait (%p885_p10), %s665_s11, 512  }
 0x157   : > { %1095 = vsyncadd (%p885_p10), %s665_s11, 4294966784  ;;  %s20_s17 = sadd.s32 1, %s1380_s5   ;;  %s1383_s12 = smov %s1102_s13 }
 0x158   : > { %p17_p0 = scmp.ge.s32.totalorder %s20_s17, 4   ;;  %s1384_s13 = smov %s1106_s14 }
 0x159   : > { %s1385_s14 = smov %s1251_s24  ;;  %s1386_s15 = smov %s1114_s16 }
 0x15a   : > { %s1387_s16 = smov %s1389_s30  ;;  %19 = sbr.rel (!%p17_p0) target bundleno = 7 (0x7), region = 94 }
 0x15f   :  { %670 = vsyncpa [#allocation3], 1 }
 0x160   :  { %672 = vsyncpa [#allocation3 + $0x1], 1 }
 0x161   :  { %673 = vsyncpa [#allocation6], 1 }
 0x162   :  { %675 = vsyncpa [#allocation6 + $0x1], 1 }
 0x163   :  { %676 = vsyncpa [#allocation4], 1 }
 0x164   :  { %678 = vsyncpa [#allocation4 + $0x1], 1 }

</bundles_post_ra>
